<compile_context>
chip_gen: v6e
topology: v6e:2x2x1
jax: 0.10.0
libtpu: 0.0.40
codegen_flags: <defaults>
</compile_context>

<pallas_src>
import numpy as np
import jax
import jax.numpy as jnp
from jax.experimental import pallas as pl
from jax.experimental.pallas import tpu as pltpu


def _sparsemax_kernel(x_ref, o_ref):
    """x_ref / o_ref: (D, TR) block -- sparsemax axis D on sublanes, rows lane-dense."""
    x = x_ref[...].astype(jnp.float32)                # (D, TR), f32 accumulation
    d = x.shape[0]

    # Sort-free support rule with a single accumulator:
    #   T_i = sum_j min(x_i - x_j, 0) == rank_i * x_i - S_i   (ties contribute 0)
    # Statically unrolled over the small sparsemax axis; VPU-only (rows stay on
    # lanes, the (1, TR) row slice broadcasts over sublanes).
    # TODO(synk): for large D fall back to a sort/cumsum formulation; the O(D^2)
    # unroll targets small D (here D=16).
    t = jnp.zeros_like(x)
    for j in range(d):
        xj = x[j:j + 1, :]                            # (1, TR)
        t = t + jnp.minimum(x - xj, 0.0)

    support = t > -1.0                                # == [1 + rank*x > S], (D, TR)
    supf = support.astype(jnp.float32)
    sx = jnp.where(support, x, 0.0)

    # k = #support, ssum = sum of supported x: unrolled sublane accumulation
    # (no cross-lane XLU reductions needed).
    k = supf[0:1, :]
    ssum = sx[0:1, :]
    for i in range(1, d):
        k = k + supf[i:i + 1, :]
        ssum = ssum + sx[i:i + 1, :]

    # tau = (ssum - 1) / k.  k is a small exact integer; approx reciprocal on
    # the EUP plus one Newton step keeps the relative error ~1e-8.
    inv_k = pl.reciprocal(k, approx=True)
    inv_k = inv_k * (2.0 - k * inv_k)
    tau = (ssum - 1.0) * inv_k                        # (1, TR)

    o_ref[...] = jnp.maximum(x - tau, 0.0).astype(o_ref.dtype)


_LANES = 128
_MAX_ROW_TILE = 16 * 1024   # (16, 16384) f32 block = 1 MiB; in+out double-buffered = 4 MiB


def _round_up(a, b):
    return ((a + b - 1) // b) * b


def sparsemax(x, dim=-1, k=None):
    """Forward pass of Sparsemax(dim, k).

    `k` is only a partial-sort performance knob in the PyTorch reference (the
    result is identical), so it is ignored here.
    """
    del k
    x = jnp.asarray(x)
    dim = dim % x.ndim

    xm = jnp.moveaxis(x, dim, -1)
    lead_shape = xm.shape[:-1]
    d = xm.shape[-1]
    n_rows = int(np.prod(lead_shape)) if lead_shape else 1

    # Lane-dense compute layout: D on sublanes, flattened rows on lanes.  The
    # reshape + transpose (+ pad, when needed) is one fused XLA copy per side.
    x2 = xm.reshape(n_rows, d).T                      # (D, n_rows)

    # Tile choice: big lane tiles to amortize per-grid-step overhead, but keep
    # >= 2 grid steps when there is enough work so v7x megacore can split rows.
    rows128 = max(_LANES, _round_up(n_rows, _LANES))
    if rows128 <= _LANES:
        tr = rows128
    else:
        n_tiles = max(2, -(-rows128 // _MAX_ROW_TILE))
        tr = _round_up(-(-rows128 // n_tiles), _LANES)
    rows_pad = _round_up(rows128, tr)
    if rows_pad != n_rows:
        x2 = jnp.pad(x2, ((0, 0), (0, rows_pad - n_rows)))

    out = pl.pallas_call(
        _sparsemax_kernel,
        out_shape=jax.ShapeDtypeStruct((d, rows_pad), x.dtype),
        grid_spec=pltpu.PrefetchScalarGridSpec(
            num_scalar_prefetch=0,
            grid=(rows_pad // tr,),
            in_specs=[pl.BlockSpec((d, tr), lambda i: (0, i))],
            out_specs=pl.BlockSpec((d, tr), lambda i: (0, i)),
        ),
        compiler_params=pltpu.CompilerParams(
            dimension_semantics=("parallel",),        # independent rows -> megacore-friendly
            vmem_limit_bytes=32 * 1024 * 1024,
        ),
    )(x2)

    out = out[:, :n_rows].T.reshape(xm.shape)
    return jnp.moveaxis(out, -1, dim)


def _sparsemax_ref(x, axis=-1):
    """Pure-JAX sort/cumsum reference (mirrors the PyTorch forward), axis=-1."""
    z = x - jnp.max(x, axis=axis, keepdims=True)
    topk = -jnp.sort(-z, axis=axis)                   # descending sort
    d = z.shape[axis]
    cs = jnp.cumsum(topk, axis=axis) - 1.0
    rhos = jnp.arange(1, d + 1, dtype=z.dtype)
    support = rhos * topk > cs
    kk = jnp.sum(support, axis=axis, keepdims=True)
    tau = jnp.take_along_axis(cs, kk - 1, axis=axis) / kk.astype(z.dtype)
    return jnp.maximum(z - tau, 0.0)


if __name__ == "__main__":
    key = jax.random.PRNGKey(0)
    x = jax.random.normal(key, (2, 4, 16, 16), dtype=jnp.float32)

    fwd = jax.jit(sparsemax)
    out = jax.block_until_ready(fwd(x))

    ref = _sparsemax_ref(x, axis=-1)
    np.testing.assert_allclose(np.asarray(out), np.asarray(ref), rtol=1e-5, atol=1e-5)
    # Projection property: sums along the sparsemax axis are 1.
    np.testing.assert_allclose(np.asarray(out).sum(-1), 1.0, rtol=1e-5, atol=1e-5)

    print("KERNEL_OK")
</pallas_src>

<mosaic_0001>
module attributes {stable_mosaic.version = 11 : i64} {
  func.func @_sparsemax_kernel(%arg0: i32, %arg1: memref<16x128xf32, #tpu.memory_space<vmem>>, %arg2: memref<16x128xf32, #tpu.memory_space<vmem>>) attributes {dimension_semantics = [#tpu.dimension_semantics<parallel>], iteration_bounds = array<i64: 1>, scalar_prefetch = 0 : i64, scratch_operands = 0 : i64, tpu.core_type = #tpu.core_type<tc>, window_params = [{transform_indices = @transform_0, window_bounds = array<i64: 16, 128>}, {transform_indices = @transform_1, window_bounds = array<i64: 16, 128>}]} {
    %c0 = arith.constant 0 : index
    %c0_0 = arith.constant 0 : index
    %0 = vector.load %arg1[%c0, %c0_0] : memref<16x128xf32, #tpu.memory_space<vmem>>, vector<16x128xf32>
    %cst = arith.constant 0.000000e+00 : f32
    %1 = vector.broadcast %cst : f32 to vector<16x128xf32>
    %2 = vector.extract_strided_slice %0 {offsets = [0, 0], sizes = [1, 128], strides = [1, 1]} : vector<16x128xf32> to vector<1x128xf32>
    %3 = vector.broadcast %2 : vector<1x128xf32> to vector<16x128xf32>
    %4 = arith.subf %0, %3 : vector<16x128xf32>
    %cst_1 = arith.constant 0.000000e+00 : f32
    %5 = vector.broadcast %cst_1 : f32 to vector<16x128xf32>
    %6 = arith.minimumf %4, %5 : vector<16x128xf32>
    %7 = arith.addf %1, %6 : vector<16x128xf32>
    %8 = vector.extract_strided_slice %0 {offsets = [1, 0], sizes = [1, 128], strides = [1, 1]} : vector<16x128xf32> to vector<1x128xf32>
    %9 = vector.broadcast %8 : vector<1x128xf32> to vector<16x128xf32>
    %10 = arith.subf %0, %9 : vector<16x128xf32>
    %cst_2 = arith.constant 0.000000e+00 : f32
    %11 = vector.broadcast %cst_2 : f32 to vector<16x128xf32>
    %12 = arith.minimumf %10, %11 : vector<16x128xf32>
    %13 = arith.addf %7, %12 : vector<16x128xf32>
    %14 = vector.extract_strided_slice %0 {offsets = [2, 0], sizes = [1, 128], strides = [1, 1]} : vector<16x128xf32> to vector<1x128xf32>
    %15 = vector.broadcast %14 : vector<1x128xf32> to vector<16x128xf32>
    %16 = arith.subf %0, %15 : vector<16x128xf32>
    %cst_3 = arith.constant 0.000000e+00 : f32
    %17 = vector.broadcast %cst_3 : f32 to vector<16x128xf32>
    %18 = arith.minimumf %16, %17 : vector<16x128xf32>
    %19 = arith.addf %13, %18 : vector<16x128xf32>
    %20 = vector.extract_strided_slice %0 {offsets = [3, 0], sizes = [1, 128], strides = [1, 1]} : vector<16x128xf32> to vector<1x128xf32>
    %21 = vector.broadcast %20 : vector<1x128xf32> to vector<16x128xf32>
    %22 = arith.subf %0, %21 : vector<16x128xf32>
    %cst_4 = arith.constant 0.000000e+00 : f32
    %23 = vector.broadcast %cst_4 : f32 to vector<16x128xf32>
    %24 = arith.minimumf %22, %23 : vector<16x128xf32>
    %25 = arith.addf %19, %24 : vector<16x128xf32>
    %26 = vector.extract_strided_slice %0 {offsets = [4, 0], sizes = [1, 128], strides = [1, 1]} : vector<16x128xf32> to vector<1x128xf32>
    %27 = vector.broadcast %26 : vector<1x128xf32> to vector<16x128xf32>
    %28 = arith.subf %0, %27 : vector<16x128xf32>
    %cst_5 = arith.constant 0.000000e+00 : f32
    %29 = vector.broadcast %cst_5 : f32 to vector<16x128xf32>
    %30 = arith.minimumf %28, %29 : vector<16x128xf32>
    %31 = arith.addf %25, %30 : vector<16x128xf32>
    %32 = vector.extract_strided_slice %0 {offsets = [5, 0], sizes = [1, 128], strides = [1, 1]} : vector<16x128xf32> to vector<1x128xf32>
    %33 = vector.broadcast %32 : vector<1x128xf32> to vector<16x128xf32>
    %34 = arith.subf %0, %33 : vector<16x128xf32>
    %cst_6 = arith.constant 0.000000e+00 : f32
    %35 = vector.broadcast %cst_6 : f32 to vector<16x128xf32>
    %36 = arith.minimumf %34, %35 : vector<16x128xf32>
    %37 = arith.addf %31, %36 : vector<16x128xf32>
    %38 = vector.extract_strided_slice %0 {offsets = [6, 0], sizes = [1, 128], strides = [1, 1]} : vector<16x128xf32> to vector<1x128xf32>
    %39 = vector.broadcast %38 : vector<1x128xf32> to vector<16x128xf32>
    %40 = arith.subf %0, %39 : vector<16x128xf32>
    %cst_7 = arith.constant 0.000000e+00 : f32
    %41 = vector.broadcast %cst_7 : f32 to vector<16x128xf32>
    %42 = arith.minimumf %40, %41 : vector<16x128xf32>
    %43 = arith.addf %37, %42 : vector<16x128xf32>
    %44 = vector.extract_strided_slice %0 {offsets = [7, 0], sizes = [1, 128], strides = [1, 1]} : vector<16x128xf32> to vector<1x128xf32>
    %45 = vector.broadcast %44 : vector<1x128xf32> to vector<16x128xf32>
    %46 = arith.subf %0, %45 : vector<16x128xf32>
    %cst_8 = arith.constant 0.000000e+00 : f32
    %47 = vector.broadcast %cst_8 : f32 to vector<16x128xf32>
    %48 = arith.minimumf %46, %47 : vector<16x128xf32>
    %49 = arith.addf %43, %48 : vector<16x128xf32>
    %50 = vector.extract_strided_slice %0 {offsets = [8, 0], sizes = [1, 128], strides = [1, 1]} : vector<16x128xf32> to vector<1x128xf32>
    %51 = vector.broadcast %50 : vector<1x128xf32> to vector<16x128xf32>
    %52 = arith.subf %0, %51 : vector<16x128xf32>
    %cst_9 = arith.constant 0.000000e+00 : f32
    %53 = vector.broadcast %cst_9 : f32 to vector<16x128xf32>
    %54 = arith.minimumf %52, %53 : vector<16x128xf32>
    %55 = arith.addf %49, %54 : vector<16x128xf32>
    %56 = vector.extract_strided_slice %0 {offsets = [9, 0], sizes = [1, 128], strides = [1, 1]} : vector<16x128xf32> to vector<1x128xf32>
    %57 = vector.broadcast %56 : vector<1x128xf32> to vector<16x128xf32>
    %58 = arith.subf %0, %57 : vector<16x128xf32>
    %cst_10 = arith.constant 0.000000e+00 : f32
    %59 = vector.broadcast %cst_10 : f32 to vector<16x128xf32>
    %60 = arith.minimumf %58, %59 : vector<16x128xf32>
    %61 = arith.addf %55, %60 : vector<16x128xf32>
    %62 = vector.extract_strided_slice %0 {offsets = [10, 0], sizes = [1, 128], strides = [1, 1]} : vector<16x128xf32> to vector<1x128xf32>
    %63 = vector.broadcast %62 : vector<1x128xf32> to vector<16x128xf32>
    %64 = arith.subf %0, %63 : vector<16x128xf32>
    %cst_11 = arith.constant 0.000000e+00 : f32
    %65 = vector.broadcast %cst_11 : f32 to vector<16x128xf32>
    %66 = arith.minimumf %64, %65 : vector<16x128xf32>
    %67 = arith.addf %61, %66 : vector<16x128xf32>
    %68 = vector.extract_strided_slice %0 {offsets = [11, 0], sizes = [1, 128], strides = [1, 1]} : vector<16x128xf32> to vector<1x128xf32>
    %69 = vector.broadcast %68 : vector<1x128xf32> to vector<16x128xf32>
    %70 = arith.subf %0, %69 : vector<16x128xf32>
    %cst_12 = arith.constant 0.000000e+00 : f32
    %71 = vector.broadcast %cst_12 : f32 to vector<16x128xf32>
    %72 = arith.minimumf %70, %71 : vector<16x128xf32>
    %73 = arith.addf %67, %72 : vector<16x128xf32>
    %74 = vector.extract_strided_slice %0 {offsets = [12, 0], sizes = [1, 128], strides = [1, 1]} : vector<16x128xf32> to vector<1x128xf32>
    %75 = vector.broadcast %74 : vector<1x128xf32> to vector<16x128xf32>
    %76 = arith.subf %0, %75 : vector<16x128xf32>
    %cst_13 = arith.constant 0.000000e+00 : f32
    %77 = vector.broadcast %cst_13 : f32 to vector<16x128xf32>
    %78 = arith.minimumf %76, %77 : vector<16x128xf32>
    %79 = arith.addf %73, %78 : vector<16x128xf32>
    %80 = vector.extract_strided_slice %0 {offsets = [13, 0], sizes = [1, 128], strides = [1, 1]} : vector<16x128xf32> to vector<1x128xf32>
    %81 = vector.broadcast %80 : vector<1x128xf32> to vector<16x128xf32>
    %82 = arith.subf %0, %81 : vector<16x128xf32>
    %cst_14 = arith.constant 0.000000e+00 : f32
    %83 = vector.broadcast %cst_14 : f32 to vector<16x128xf32>
    %84 = arith.minimumf %82, %83 : vector<16x128xf32>
    %85 = arith.addf %79, %84 : vector<16x128xf32>
    %86 = vector.extract_strided_slice %0 {offsets = [14, 0], sizes = [1, 128], strides = [1, 1]} : vector<16x128xf32> to vector<1x128xf32>
    %87 = vector.broadcast %86 : vector<1x128xf32> to vector<16x128xf32>
    %88 = arith.subf %0, %87 : vector<16x128xf32>
    %cst_15 = arith.constant 0.000000e+00 : f32
    %89 = vector.broadcast %cst_15 : f32 to vector<16x128xf32>
    %90 = arith.minimumf %88, %89 : vector<16x128xf32>
    %91 = arith.addf %85, %90 : vector<16x128xf32>
    %92 = vector.extract_strided_slice %0 {offsets = [15, 0], sizes = [1, 128], strides = [1, 1]} : vector<16x128xf32> to vector<1x128xf32>
    %93 = vector.broadcast %92 : vector<1x128xf32> to vector<16x128xf32>
    %94 = arith.subf %0, %93 : vector<16x128xf32>
    %cst_16 = arith.constant 0.000000e+00 : f32
    %95 = vector.broadcast %cst_16 : f32 to vector<16x128xf32>
    %96 = arith.minimumf %94, %95 : vector<16x128xf32>
    %97 = arith.addf %91, %96 : vector<16x128xf32>
    %cst_17 = arith.constant -1.000000e+00 : f32
    %98 = vector.broadcast %cst_17 : f32 to vector<16x128xf32>
    %99 = arith.cmpf ogt, %97, %98 : vector<16x128xf32>
    %100 = arith.extui %99 : vector<16x128xi1> to vector<16x128xi32>
    %101 = arith.sitofp %100 : vector<16x128xi32> to vector<16x128xf32>
    %cst_18 = arith.constant 0.000000e+00 : f32
    %102 = vector.broadcast %cst_18 : f32 to vector<16x128xf32>
    %103 = arith.select %99, %0, %102 : vector<16x128xi1>, vector<16x128xf32>
    %104 = vector.extract_strided_slice %101 {offsets = [0, 0], sizes = [1, 128], strides = [1, 1]} : vector<16x128xf32> to vector<1x128xf32>
    %105 = vector.extract_strided_slice %103 {offsets = [0, 0], sizes = [1, 128], strides = [1, 1]} : vector<16x128xf32> to vector<1x128xf32>
    %106 = vector.extract_strided_slice %101 {offsets = [1, 0], sizes = [1, 128], strides = [1, 1]} : vector<16x128xf32> to vector<1x128xf32>
    %107 = arith.addf %104, %106 : vector<1x128xf32>
    %108 = vector.extract_strided_slice %103 {offsets = [1, 0], sizes = [1, 128], strides = [1, 1]} : vector<16x128xf32> to vector<1x128xf32>
    %109 = arith.addf %105, %108 : vector<1x128xf32>
    %110 = vector.extract_strided_slice %101 {offsets = [2, 0], sizes = [1, 128], strides = [1, 1]} : vector<16x128xf32> to vector<1x128xf32>
    %111 = arith.addf %107, %110 : vector<1x128xf32>
    %112 = vector.extract_strided_slice %103 {offsets = [2, 0], sizes = [1, 128], strides = [1, 1]} : vector<16x128xf32> to vector<1x128xf32>
    %113 = arith.addf %109, %112 : vector<1x128xf32>
    %114 = vector.extract_strided_slice %101 {offsets = [3, 0], sizes = [1, 128], strides = [1, 1]} : vector<16x128xf32> to vector<1x128xf32>
    %115 = arith.addf %111, %114 : vector<1x128xf32>
    %116 = vector.extract_strided_slice %103 {offsets = [3, 0], sizes = [1, 128], strides = [1, 1]} : vector<16x128xf32> to vector<1x128xf32>
    %117 = arith.addf %113, %116 : vector<1x128xf32>
    %118 = vector.extract_strided_slice %101 {offsets = [4, 0], sizes = [1, 128], strides = [1, 1]} : vector<16x128xf32> to vector<1x128xf32>
    %119 = arith.addf %115, %118 : vector<1x128xf32>
    %120 = vector.extract_strided_slice %103 {offsets = [4, 0], sizes = [1, 128], strides = [1, 1]} : vector<16x128xf32> to vector<1x128xf32>
    %121 = arith.addf %117, %120 : vector<1x128xf32>
    %122 = vector.extract_strided_slice %101 {offsets = [5, 0], sizes = [1, 128], strides = [1, 1]} : vector<16x128xf32> to vector<1x128xf32>
    %123 = arith.addf %119, %122 : vector<1x128xf32>
    %124 = vector.extract_strided_slice %103 {offsets = [5, 0], sizes = [1, 128], strides = [1, 1]} : vector<16x128xf32> to vector<1x128xf32>
    %125 = arith.addf %121, %124 : vector<1x128xf32>
    %126 = vector.extract_strided_slice %101 {offsets = [6, 0], sizes = [1, 128], strides = [1, 1]} : vector<16x128xf32> to vector<1x128xf32>
    %127 = arith.addf %123, %126 : vector<1x128xf32>
    %128 = vector.extract_strided_slice %103 {offsets = [6, 0], sizes = [1, 128], strides = [1, 1]} : vector<16x128xf32> to vector<1x128xf32>
    %129 = arith.addf %125, %128 : vector<1x128xf32>
    %130 = vector.extract_strided_slice %101 {offsets = [7, 0], sizes = [1, 128], strides = [1, 1]} : vector<16x128xf32> to vector<1x128xf32>
    %131 = arith.addf %127, %130 : vector<1x128xf32>
    %132 = vector.extract_strided_slice %103 {offsets = [7, 0], sizes = [1, 128], strides = [1, 1]} : vector<16x128xf32> to vector<1x128xf32>
    %133 = arith.addf %129, %132 : vector<1x128xf32>
    %134 = vector.extract_strided_slice %101 {offsets = [8, 0], sizes = [1, 128], strides = [1, 1]} : vector<16x128xf32> to vector<1x128xf32>
    %135 = arith.addf %131, %134 : vector<1x128xf32>
    %136 = vector.extract_strided_slice %103 {offsets = [8, 0], sizes = [1, 128], strides = [1, 1]} : vector<16x128xf32> to vector<1x128xf32>
    %137 = arith.addf %133, %136 : vector<1x128xf32>
    %138 = vector.extract_strided_slice %101 {offsets = [9, 0], sizes = [1, 128], strides = [1, 1]} : vector<16x128xf32> to vector<1x128xf32>
    %139 = arith.addf %135, %138 : vector<1x128xf32>
    %140 = vector.extract_strided_slice %103 {offsets = [9, 0], sizes = [1, 128], strides = [1, 1]} : vector<16x128xf32> to vector<1x128xf32>
    %141 = arith.addf %137, %140 : vector<1x128xf32>
    %142 = vector.extract_strided_slice %101 {offsets = [10, 0], sizes = [1, 128], strides = [1, 1]} : vector<16x128xf32> to vector<1x128xf32>
    %143 = arith.addf %139, %142 : vector<1x128xf32>
    %144 = vector.extract_strided_slice %103 {offsets = [10, 0], sizes = [1, 128], strides = [1, 1]} : vector<16x128xf32> to vector<1x128xf32>
    %145 = arith.addf %141, %144 : vector<1x128xf32>
    %146 = vector.extract_strided_slice %101 {offsets = [11, 0], sizes = [1, 128], strides = [1, 1]} : vector<16x128xf32> to vector<1x128xf32>
    %147 = arith.addf %143, %146 : vector<1x128xf32>
    %148 = vector.extract_strided_slice %103 {offsets = [11, 0], sizes = [1, 128], strides = [1, 1]} : vector<16x128xf32> to vector<1x128xf32>
    %149 = arith.addf %145, %148 : vector<1x128xf32>
    %150 = vector.extract_strided_slice %101 {offsets = [12, 0], sizes = [1, 128], strides = [1, 1]} : vector<16x128xf32> to vector<1x128xf32>
    %151 = arith.addf %147, %150 : vector<1x128xf32>
    %152 = vector.extract_strided_slice %103 {offsets = [12, 0], sizes = [1, 128], strides = [1, 1]} : vector<16x128xf32> to vector<1x128xf32>
    %153 = arith.addf %149, %152 : vector<1x128xf32>
    %154 = vector.extract_strided_slice %101 {offsets = [13, 0], sizes = [1, 128], strides = [1, 1]} : vector<16x128xf32> to vector<1x128xf32>
    %155 = arith.addf %151, %154 : vector<1x128xf32>
    %156 = vector.extract_strided_slice %103 {offsets = [13, 0], sizes = [1, 128], strides = [1, 1]} : vector<16x128xf32> to vector<1x128xf32>
    %157 = arith.addf %153, %156 : vector<1x128xf32>
    %158 = vector.extract_strided_slice %101 {offsets = [14, 0], sizes = [1, 128], strides = [1, 1]} : vector<16x128xf32> to vector<1x128xf32>
    %159 = arith.addf %155, %158 : vector<1x128xf32>
    %160 = vector.extract_strided_slice %103 {offsets = [14, 0], sizes = [1, 128], strides = [1, 1]} : vector<16x128xf32> to vector<1x128xf32>
    %161 = arith.addf %157, %160 : vector<1x128xf32>
    %162 = vector.extract_strided_slice %101 {offsets = [15, 0], sizes = [1, 128], strides = [1, 1]} : vector<16x128xf32> to vector<1x128xf32>
    %163 = arith.addf %159, %162 : vector<1x128xf32>
    %164 = vector.extract_strided_slice %103 {offsets = [15, 0], sizes = [1, 128], strides = [1, 1]} : vector<16x128xf32> to vector<1x128xf32>
    %165 = arith.addf %161, %164 : vector<1x128xf32>
    %166 = tpu.reciprocal %163 {approx = true} : vector<1x128xf32> -> vector<1x128xf32>
    %167 = arith.mulf %163, %166 : vector<1x128xf32>
    %cst_19 = arith.constant 2.000000e+00 : f32
    %168 = vector.broadcast %cst_19 : f32 to vector<1x128xf32>
    %169 = arith.subf %168, %167 : vector<1x128xf32>
    %170 = arith.mulf %166, %169 : vector<1x128xf32>
    %cst_20 = arith.constant 1.000000e+00 : f32
    %171 = vector.broadcast %cst_20 : f32 to vector<1x128xf32>
    %172 = arith.subf %165, %171 : vector<1x128xf32>
    %173 = arith.mulf %172, %170 : vector<1x128xf32>
    %174 = vector.broadcast %173 : vector<1x128xf32> to vector<16x128xf32>
    %175 = arith.subf %0, %174 : vector<16x128xf32>
    %cst_21 = arith.constant 0.000000e+00 : f32
    %176 = vector.broadcast %cst_21 : f32 to vector<16x128xf32>
    %177 = arith.maximumf %175, %176 : vector<16x128xf32>
    %c0_22 = arith.constant 0 : index
    %c0_23 = arith.constant 0 : index
    %178 = vector.load %arg2[%c0_22, %c0_23] : memref<16x128xf32, #tpu.memory_space<vmem>>, vector<16x128xf32>
    tpu.vector_store %arg2[%c0_22, %c0_23], %177 {strides = array<i32>} : memref<16x128xf32, #tpu.memory_space<vmem>>, vector<16x128xf32>,
    return
  }
  func.func @transform_0(%arg0: i32) -> (i32, i32) {
    %c0_i32 = arith.constant 0 : i32
    %c0_i32_0 = arith.constant 0 : i32
    return %c0_i32, %arg0 : i32, i32
  }
  func.func @transform_1(%arg0: i32) -> (i32, i32) {
    %c0_i32 = arith.constant 0 : i32
    %c0_i32_0 = arith.constant 0 : i32
    return %c0_i32, %arg0 : i32, i32
  }
}

</mosaic_0001>

<bundles_post_ra>
// kernel: sparsemax.1
= control target key start
LH: loop header
LB: loop body
LE: loop exit
PB: predicated region body
PF: predicated region fallthrough
CT: control target
= control target key end

     0   :  { %v10_v0 = vlaneseq  ;;  %s404_s0 = inlined_call_operand.vmem [shape: f32[16,128], index: 0, kind: input, shape index: {}]   ;;  %s405_s1 = inlined_call_operand.vmem [shape: f32[16,128], index: 1, kind: output, shape index: {}]  }
   0x1   :  { %v310_v2 = vld [vmem:[%s404_s0] sm:$0xff]  ;;  %v330_v15 = vld [vmem:[%s404_s0 + $0x8] sm:$0xff] }
   0x2   :  { %v305_v1 = vshrl.u32 %v10_v0, 7 }
   0x4   :  { %v313_v3 = vsub.s32 0, %v305_v1  ;;  %v22_v4 = vsub.s32 1, %v305_v1  ;;  %v32_v5 = vsub.s32 2, %v305_v1  ;;  %v42_v6 = vsub.s32 3, %v305_v1 }
   0x5   :  { %v52_v7 = vsub.s32 4, %v305_v1  ;;  %v62_v8 = vsub.s32 5, %v305_v1  ;;  %v72_v9 = vsub.s32 6, %v305_v1  ;;  %v82_v10 = vsub.s32 7, %v305_v1 }
   0x6   :  { %v13_v11 = vrot.slane %v310_v2, %v313_v3  ;;  %v23_v12 = vrot.slane %v310_v2, %v22_v4  ;;  %v33_v13 = vrot.slane %v310_v2, %v32_v5  ;;  %v43_v14 = vrot.slane %v310_v2, %v42_v6 }
   0x7   :  { %v53_v16 = vrot.slane %v310_v2, %v52_v7  ;;  %v63_v17 = vrot.slane %v310_v2, %v62_v8  ;;  %v73_v18 = vrot.slane %v310_v2, %v72_v9  ;;  %v83_v19 = vrot.slane %v310_v2, %v82_v10 }
   0x8   :  { %v14_v20 = vsub.f32 %v310_v2, %v13_v11  ;;  %v15_v21 = vsub.f32 %v330_v15, %v13_v11  ;;  %v24_v22 = vsub.f32 %v310_v2, %v23_v12  ;;  %v25_v23 = vsub.f32 %v330_v15, %v23_v12 }
   0x9   :  { %v34_v24 = vsub.f32 %v310_v2, %v33_v13  ;;  %v35_v25 = vsub.f32 %v330_v15, %v33_v13  ;;  %v44_v26 = vsub.f32 %v310_v2, %v43_v14  ;;  %v45_v27 = vsub.f32 %v330_v15, %v43_v14 }
   0xa   :  { %v16_v28 = vmin.f32 %v14_v20, 0.0  ;;  %v17_v29 = vmin.f32 %v15_v21, 0.0  ;;  %v26_v30 = vmin.f32 %v24_v22, 0.0  ;;  %v27_v31 = vmin.f32 %v25_v23, 0.0 }
   0xb   :  { %v36_v32 = vmin.f32 %v34_v24, 0.0  ;;  %v37_v33 = vmin.f32 %v35_v25, 0.0  ;;  %v46_v34 = vmin.f32 %v44_v26, 0.0  ;;  %v47_v35 = vmin.f32 %v45_v27, 0.0 }
   0xc   :  { %v28_v36 = vadd.f32 %v26_v30, %v16_v28  ;;  %v29_v37 = vadd.f32 %v27_v31, %v17_v29  ;;  %v54_v38 = vsub.f32 %v310_v2, %v53_v16  ;;  %v55_v39 = vsub.f32 %v330_v15, %v53_v16 }
   0xd   :  { %v64_v40 = vsub.f32 %v310_v2, %v63_v17  ;;  %v65_v41 = vsub.f32 %v330_v15, %v63_v17  ;;  %v74_v42 = vsub.f32 %v310_v2, %v73_v18  ;;  %v75_v43 = vsub.f32 %v330_v15, %v73_v18 }
   0xe   :  { %v38_v44 = vadd.f32 %v36_v32, %v28_v36  ;;  %v39_v45 = vadd.f32 %v37_v33, %v29_v37  ;;  %v56_v46 = vmin.f32 %v54_v38, 0.0  ;;  %v57_v47 = vmin.f32 %v55_v39, 0.0 }
   0xf   :  { %v66_v48 = vmin.f32 %v64_v40, 0.0  ;;  %v67_v49 = vmin.f32 %v65_v41, 0.0  ;;  %v84_v52 = vsub.f32 %v310_v2, %v83_v19  ;;  %v85_v53 = vsub.f32 %v330_v15, %v83_v19 }
  0x10   :  { %v48_v50 = vadd.f32 %v46_v34, %v38_v44  ;;  %v49_v51 = vadd.f32 %v47_v35, %v39_v45  ;;  %v76_v54 = vmin.f32 %v74_v42, 0.0  ;;  %v93_v55 = vrot.slane %v330_v15, %v313_v3 }
  0x11   :  { %v103_v56 = vrot.slane %v330_v15, %v22_v4  ;;  %v113_v57 = vrot.slane %v330_v15, %v32_v5  ;;  %v77_v60 = vmin.f32 %v75_v43, 0.0  ;;  %v123_v61 = vrot.slane %v330_v15, %v42_v6 }
  0x12   :  { %v58_v58 = vadd.f32 %v56_v46, %v48_v50  ;;  %v59_v59 = vadd.f32 %v57_v47, %v49_v51  ;;  %v94_v62 = vsub.f32 %v310_v2, %v93_v55  ;;  %v95_v63 = vsub.f32 %v330_v15, %v93_v55 }
  0x13   :  { %v104_v0 = vsub.f32 %v310_v2, %v103_v56  ;;  %v105_v11 = vsub.f32 %v330_v15, %v103_v56  ;;  %v86_v14 = vmin.f32 %v84_v52, 0.0  ;;  %v87_v16 = vmin.f32 %v85_v53, 0.0 }
  0x14   :  { %v68_v12 = vadd.f32 %v66_v48, %v58_v58  ;;  %v69_v13 = vadd.f32 %v67_v49, %v59_v59  ;;  %v114_v4 = vsub.f32 %v310_v2, %v113_v57  ;;  %v115_v5 = vsub.f32 %v330_v15, %v113_v57 }
  0x15   :  { %v96_v19 = vmin.f32 %v94_v62, 0.0  ;;  %v97_v6 = vmin.f32 %v95_v63, 0.0  ;;  %v106_v20 = vmin.f32 %v104_v0, 0.0  ;;  %v107_v21 = vmin.f32 %v105_v11, 0.0 }
  0x16   :  { %v78_v17 = vadd.f32 %v76_v54, %v68_v12  ;;  %v79_v18 = vadd.f32 %v77_v60, %v69_v13  ;;  %v124_v22 = vsub.f32 %v310_v2, %v123_v61  ;;  %v133_v23 = vrot.slane %v330_v15, %v52_v7 }
  0x17   :  { %v125_v26 = vsub.f32 %v330_v15, %v123_v61  ;;  %v143_v27 = vrot.slane %v330_v15, %v62_v8  ;;  %v116_v28 = vmin.f32 %v114_v4, 0.0  ;;  %v117_v29 = vmin.f32 %v115_v5, 0.0 }
  0x18   :  { %v88_v24 = vadd.f32 %v86_v14, %v78_v17  ;;  %v89_v25 = vadd.f32 %v87_v16, %v79_v18  ;;  %v134_v32 = vsub.f32 %v310_v2, %v133_v23  ;;  %v153_v33 = vrot.slane %v330_v15, %v72_v9 }
  0x19   :  { %v126_v34 = vmin.f32 %v124_v22, 0.0  ;;  %v135_v7 = vsub.f32 %v330_v15, %v133_v23  ;;  %v163_v35 = vrot.slane %v330_v15, %v82_v10  ;;  %v127_v8 = vmin.f32 %v125_v26, 0.0 }
  0x1a   :  { %v98_v30 = vadd.f32 %v96_v19, %v88_v24  ;;  %v99_v31 = vadd.f32 %v97_v6, %v89_v25  ;;  %v144_v38 = vsub.f32 %v310_v2, %v143_v27  ;;  %v136_v41 = vmin.f32 %v134_v32, 0.0 }
  0x1b   :  { %v154_v42 = vsub.f32 %v310_v2, %v153_v33  ;;  %v137_v43 = vmin.f32 %v135_v7, 0.0  ;;  %v145_v9 = vsub.f32 %v330_v15, %v143_v27  ;;  %v164_v1 = vsub.f32 %v310_v2, %v163_v35 }
  0x1c   :  { %v108_v36 = vadd.f32 %v106_v20, %v98_v30  ;;  %v109_v37 = vadd.f32 %v107_v21, %v99_v31  ;;  %v146_v46 = vmin.f32 %v144_v38, 0.0  ;;  %v155_v50 = vsub.f32 %v330_v15, %v153_v33 }
  0x1d   :  { %v156_v10 = vmin.f32 %v154_v42, 0.0  ;;  %v147_v49 = vmin.f32 %v145_v9, 0.0  ;;  %v166_v52 = vmin.f32 %v164_v1, 0.0  ;;  %v165_v56 = vsub.f32 %v330_v15, %v163_v35 }
  0x1e   :  { %v118_v39 = vadd.f32 %v116_v28, %v108_v36  ;;  %v119_v40 = vadd.f32 %v117_v29, %v109_v37  ;;  %v157_v55 = vmin.f32 %v155_v50, 0.0  ;;  %v294_v60 = vmov 0.0  }
  0x1f   :  { %v167_v59 = vmin.f32 %v165_v56, 0.0 }
  0x20   :  { %v128_v44 = vadd.f32 %v126_v34, %v118_v39  ;;  %v129_v45 = vadd.f32 %v127_v8, %v119_v40 }
  0x22   :  { %v138_v47 = vadd.f32 %v136_v41, %v128_v44  ;;  %v139_v48 = vadd.f32 %v137_v43, %v129_v45 }
  0x24   :  { %v148_v51 = vadd.f32 %v146_v46, %v138_v47  ;;  %v149_v54 = vadd.f32 %v147_v49, %v139_v48 }
  0x26   :  { %v158_v53 = vadd.f32 %v156_v10, %v148_v51  ;;  %v159_v58 = vadd.f32 %v157_v55, %v149_v54 }
  0x28   :  { %v168_v57 = vadd.f32 %v166_v52, %v158_v53  ;;  %v169_v5 = vadd.f32 %v167_v59, %v159_v58 }
  0x2a   :  { %vm170_vm0 = vcmp.gt.f32.partialorder %v168_v57, -1.0  ;;  %vm171_vm1 = vcmp.gt.f32.partialorder %v169_v5, -1.0 }
  0x2b   :  { %v288_v61 = vsel %vm170_vm0, 1.0, %v294_v60  ;;  %v176_v62 = vsel %vm170_vm0, %v310_v2, 0.0  ;;  %v289_v32 = vsel %vm171_vm1, 1.0, %v294_v60  ;;  %v177_v7 = vsel %vm171_vm1, %v330_v15, 0.0 }
  0x2c   :  { %v179_v63 = vrot.slane %v288_v61, 1  ;;  %v183_v0 = vrot.slane %v176_v62, 1  ;;  %v186_v11 = vrot.slane %v288_v61, 2  ;;  %v189_v12 = vrot.slane %v176_v62, 2 }
  0x2d   :  { %v192_v16 = vrot.slane %v288_v61, 3  ;;  %v195_v4 = vrot.slane %v176_v62, 3  ;;  %v198_v19 = vrot.slane %v288_v61, 4  ;;  %v201_v6 = vrot.slane %v176_v62, 4 }
  0x2e   :  { %v181_v13 = vadd.f32 %v288_v61, %v179_v63  ;;  %v185_v14 = vadd.f32 %v183_v0, %v176_v62  ;;  %v204_v22 = vrot.slane %v288_v61, 5  ;;  %v207_v23 = vrot.slane %v176_v62, 5 }
  0x2f   :  { %v210_v26 = vrot.slane %v288_v61, 6  ;;  %v213_v27 = vrot.slane %v176_v62, 6  ;;  %v216_v30 = vrot.slane %v288_v61, 7  ;;  %v219_v31 = vrot.slane %v176_v62, 7 }
  0x30   :  { %v188_v17 = vadd.f32 %v186_v11, %v181_v13  ;;  %v191_v18 = vadd.f32 %v189_v12, %v185_v14  ;;  %v225_v37 = vrot.slane %v289_v32, 1  ;;  %v229_v39 = vrot.slane %v177_v7, 1 }
  0x31   :  { %v232_v40 = vrot.slane %v289_v32, 2  ;;  %v238_v42 = vrot.slane %v289_v32, 3  ;;  %v235_v44 = vrot.slane %v177_v7, 2  ;;  %v244_v45 = vrot.slane %v289_v32, 4 }
  0x32   :  { %v194_v20 = vadd.f32 %v192_v16, %v188_v17  ;;  %v197_v21 = vadd.f32 %v195_v4, %v191_v18  ;;  %v250_v1 = vrot.slane %v289_v32, 5  ;;  %v241_v10 = vrot.slane %v177_v7, 3 }
  0x33   :  { %v256_v49 = vrot.slane %v289_v32, 6  ;;  %v262_v51 = vrot.slane %v289_v32, 7  ;;  %v247_v53 = vrot.slane %v177_v7, 4  ;;  %v253_v57 = vrot.slane %v177_v7, 5 }
  0x34   :  { %v200_v24 = vadd.f32 %v198_v19, %v194_v20  ;;  %v203_v25 = vadd.f32 %v201_v6, %v197_v21  ;;  %v259_v59 = vrot.slane %v177_v7, 6  ;;  %v265_v61 = vrot.slane %v177_v7, 7 }
  0x36   :  { %v206_v28 = vadd.f32 %v204_v22, %v200_v24  ;;  %v209_v29 = vadd.f32 %v207_v23, %v203_v25 }
  0x38   :  { %v212_v33 = vadd.f32 %v210_v26, %v206_v28  ;;  %v215_v34 = vadd.f32 %v213_v27, %v209_v29 }
  0x3a   :  { %v218_v35 = vadd.f32 %v216_v30, %v212_v33  ;;  %v221_v36 = vadd.f32 %v219_v31, %v215_v34 }
  0x3c   :  { %v222_v8 = vadd.f32 %v289_v32, %v218_v35  ;;  %v223_v38 = vadd.f32 %v221_v36, %v177_v7 }
  0x3e   :  { %v227_v41 = vadd.f32 %v225_v37, %v222_v8  ;;  %v231_v43 = vadd.f32 %v229_v39, %v223_v38 }
  0x40   :  { %v234_v9 = vadd.f32 %v232_v40, %v227_v41  ;;  %v237_v47 = vadd.f32 %v235_v44, %v231_v43 }
  0x42   :  { %v240_v46 = vadd.f32 %v238_v42, %v234_v9  ;;  %v243_v52 = vadd.f32 %v241_v10, %v237_v47 }
  0x44   :  { %v246_v48 = vadd.f32 %v244_v45, %v240_v46  ;;  %v249_v56 = vadd.f32 %v247_v53, %v243_v52 }
  0x46   :  { %v252_v50 = vadd.f32 %v250_v1, %v246_v48  ;;  %v255_v58 = vadd.f32 %v253_v57, %v249_v56 }
  0x48   :  { %v258_v54 = vadd.f32 %v256_v49, %v252_v50  ;;  %v261_v60 = vadd.f32 %v259_v59, %v255_v58 }
  0x4a   :  { %v264_v55 = vadd.f32 %v262_v51, %v258_v54  ;;  %v267_v62 = vadd.f32 %v265_v61, %v261_v60 }
  0x4c   :  { %292 = vrcp.f32 %v264_v55  ;;  %v290_v12 = vadd.f32 -1.0, %v267_v62 }
  0x59   :  { %v293_v63 = vpop.eup %292 }
  0x5a   :  { %v269_v0 = vmul.f32 %v293_v63, %v264_v55 }
  0x5c   :  { %v270_v11 = vsub.f32 2.0, %v269_v0 }
  0x5e   :  { %v271_v13 = vmul.f32 %v293_v63, %v270_v11 }
  0x60   :  { %v273_v14 = vmul.f32 %v290_v12, %v271_v13 }
  0x62   :  { %v277_v16 = vrot.slane %v273_v14, %v313_v3 }
  0x64   :  { %v278_v4 = vsub.f32 %v310_v2, %v277_v16  ;;  %v279_v5 = vsub.f32 %v330_v15, %v277_v16 }
  0x66   :  { %v280_v17 = vmax.f32 %v278_v4, 0.0  ;;  %v281_v18 = vmax.f32 %v279_v5, 0.0 }
  0x68   :  { %282 = vst [vmem:[%s405_s1] sm:$0xff] %v280_v17  ;;  %283 = vst [vmem:[%s405_s1 + $0x8] sm:$0xff] %v281_v18 }

</bundles_post_ra>
